<compile_context>
chip_gen: v6e
topology: v6e:2x2x1
jax: 0.10.0
libtpu: 0.0.40
codegen_flags: <defaults>
</compile_context>

<pallas_src>
import jax
import jax.numpy as jnp
from jax import lax
from jax.experimental import pallas as pl
from jax.experimental.pallas import tpu as pltpu


def _attn_kernel(emb_ref, hp_ref, we_ref, v_ref, out_ref):
    # emb_ref: (Bt, S, H) [compute dtype]   hp_ref: (Bt, H) f32 (= hidden@Wh^T + b)
    # we_ref:  (H, H)     [compute dtype]   v_ref:  (1, H) f32
    # out_ref: (Bt, S) f32
    #
    # Single MXU contraction over the last axis; keeps the (Bt, S, H) shape so
    # no reshape/relayout copies are materialized in VMEM.
    lin = lax.dot_general(
        emb_ref[...], we_ref[...],
        dimension_numbers=(((2,), (0,)), ((), ())),
        preferred_element_type=jnp.float32)                    # (Bt, S, H) f32

    energy = jnp.tanh(lin + hp_ref[...][:, None, :])           # (Bt, S, H) f32

    # v-projection as a VPU multiply + lane reduction (avoids an N=1 MXU matmul).
    scores = jnp.sum(energy * v_ref[...], axis=-1)             # (Bt, S)

    # Softmax over the seq axis: last-axis (lane-dense) reductions and a
    # lane-dense (Bt, S) store.  Exact reciprocal keeps the 1e-5 tolerance.
    m = jnp.max(scores, axis=-1, keepdims=True)                # (Bt, 1)
    e = jnp.exp(scores - m)                                    # (Bt, S)
    denom = jnp.sum(e, axis=-1, keepdims=True)                 # (Bt, 1)
    out_ref[...] = e * pl.reciprocal(denom, approx=False)      # (Bt, S)


def _vmem_capacity_bytes():
    """Physical VMEM of the current chip; conservative 64 MiB fallback (v7x)."""
    try:
        info = pltpu.get_tpu_info()
        cap = getattr(info, "vmem_capacity_bytes", None)
        if cap:
            return int(cap)
    except Exception:
        pass
    return 64 * 1024 * 1024


def _vmem_bytes_estimate(bt, S, H, emb_itemsize, w_itemsize):
    """Per-step VMEM footprint estimate (double-buffered I/O + f32 intermediates)."""
    f32 = 4
    emb_tile = 2 * bt * S * H * emb_itemsize    # streamed embedded tile, 2 buffers
    hp_tile = 2 * bt * H * f32                  # hidden-projection tile
    out_tile = 2 * bt * S * f32                 # output tile
    weights = H * H * w_itemsize + H * f32      # resident We^T + v row
    interm = 2 * bt * S * H * f32               # lin + energy live in f32
    return emb_tile + hp_tile + out_tile + weights + interm


def _pick_batch_tile(B, S, H, emb_itemsize, w_itemsize, vmem_budget):
    """Largest batch tile that (a) is a multiple-of-8 divisor of B (or B itself,
    to satisfy the (8,128) block rule), (b) fits the VMEM budget, and
    (c) when possible leaves >= 2 grid steps so both v7x TensorCores get work."""
    cands = [d for d in range(8, B + 1, 8) if B % d == 0]
    if B not in cands:
        cands.append(B)                       # whole-batch block is always legal
    cands = sorted(set(cands), reverse=True)

    fitting = [bt for bt in cands
               if _vmem_bytes_estimate(bt, S, H, emb_itemsize, w_itemsize)
               <= vmem_budget]
    if not fitting:
        return min(cands)                     # smallest legal tile
    multi = [bt for bt in fitting if B // bt >= 2]
    return multi[0] if multi else fitting[0]


def attention_forward(embedded, hidden, attn_weight, attn_bias, v_weight,
                      *, compute_dtype=jnp.float32):
    """embedded: [B, S, H] f32, hidden: [B, H] f32.
    attn_weight: [H, 2H], attn_bias: [H], v_weight: [1, H] (PyTorch Linear layout).
    compute_dtype: dtype used for the streamed embedded operand and We^T on the
    MXU (jnp.bfloat16 halves HBM traffic; accumulation/softmax stay f32).
    Returns softmax attention weights [B, S]."""
    B, S, H = embedded.shape
    assert hidden.shape == (B, H)
    assert B == S, "original module requires embedded.shape[0] == embedded.shape[1]"

    # Split the concat-weight; hoist the hidden projection into one XLA matmul.
    we_t = jnp.transpose(attn_weight[:, :H]).astype(compute_dtype)     # (H, H)
    wh_t = jnp.transpose(attn_weight[:, H:])                            # (H, H)
    hp = (jnp.dot(hidden, wh_t) + attn_bias).astype(jnp.float32)        # (B, H)
    v_row = v_weight.reshape(1, H).astype(jnp.float32)                  # (1, H)
    emb = embedded.astype(compute_dtype)                                # (B, S, H)

    # VMEM-budgeted batch tile (v7x has 64 MiB physical; v5e/v6e have 128 MiB).
    vmem_cap = _vmem_capacity_bytes()
    vmem_target = int(0.75 * vmem_cap)
    bt = _pick_batch_tile(B, S, H, emb.dtype.itemsize, we_t.dtype.itemsize,
                          vmem_target)
    grid = (B // bt,)
    est = _vmem_bytes_estimate(bt, S, H, emb.dtype.itemsize, we_t.dtype.itemsize)
    vmem_limit = int(min(vmem_cap, max(vmem_target, int(1.25 * est))))

    out = pl.pallas_call(
        _attn_kernel,
        out_shape=jax.ShapeDtypeStruct((B, S), jnp.float32),
        grid_spec=pltpu.PrefetchScalarGridSpec(
            num_scalar_prefetch=0,
            grid=grid,
            in_specs=[
                pl.BlockSpec((bt, S, H), lambda i: (i, 0, 0)),  # embedded tile
                pl.BlockSpec((bt, H), lambda i: (i, 0)),         # hidden proj tile
                pl.BlockSpec((H, H), lambda i: (0, 0)),          # We^T (resident)
                pl.BlockSpec((1, H), lambda i: (0, 0)),          # v row
            ],
            out_specs=pl.BlockSpec((bt, S), lambda i: (i, 0)),   # lane-dense [Bt, S]
        ),
        compiler_params=pltpu.CompilerParams(
            dimension_semantics=("parallel",),
            vmem_limit_bytes=vmem_limit),
    )(emb, hp, we_t, v_row)

    return out                                                   # (B, S)


def attention_reference(embedded, hidden, attn_weight, attn_bias, v_weight):
    """Pure-JAX reference mirroring the PyTorch forward (f32)."""
    B, S, H = embedded.shape
    hid_rep = jnp.repeat(hidden[:, None, :], S, axis=1)           # (B, S, H)
    cat = jnp.concatenate([embedded, hid_rep], axis=2)            # (B, S, 2H)
    energy = jnp.tanh(cat @ attn_weight.T + attn_bias)            # (B, S, H)
    attention = (energy @ v_weight.T)[..., 0]                     # (B, S)
    return jax.nn.softmax(attention, axis=1)


if __name__ == "__main__":
    B = 8          # == S (required by the original module's src_len usage)
    S = 8
    H = 32

    key = jax.random.PRNGKey(0)
    k_emb, k_hid, k_w, k_b, k_v = jax.random.split(key, 5)

    embedded = jax.random.normal(k_emb, (B, S, H), dtype=jnp.float32)
    hidden = jax.random.normal(k_hid, (B, H), dtype=jnp.float32)

    # Deterministic parameter init (uniform, like torch.nn.Linear defaults).
    bound_attn = 1.0 / jnp.sqrt(2.0 * H)
    attn_weight = jax.random.uniform(k_w, (H, 2 * H), jnp.float32,
                                     -bound_attn, bound_attn)
    attn_bias = jax.random.uniform(k_b, (H,), jnp.float32,
                                   -bound_attn, bound_attn)
    bound_v = 1.0 / jnp.sqrt(float(H))
    v_weight = jax.random.uniform(k_v, (1, H), jnp.float32, -bound_v, bound_v)

    ref = attention_reference(embedded, hidden, attn_weight, attn_bias, v_weight)

    # Exact-precision path (f32 everywhere): tight tolerance vs. reference.
    out = attention_forward(embedded, hidden, attn_weight, attn_bias, v_weight)
    out = jax.block_until_ready(out)
    assert out.shape == (B, S)
    assert jnp.allclose(out, ref, atol=1e-5, rtol=1e-5), "f32 mismatch vs reference"
    assert jnp.allclose(jnp.sum(out, axis=1), 1.0, atol=1e-5)

    # Bandwidth-optimized path (bf16 streamed operand + weights, f32 math):
    # the recommended production configuration; looser tolerance from bf16 inputs.
    out_bf16 = attention_forward(embedded, hidden, attn_weight, attn_bias,
                                 v_weight, compute_dtype=jnp.bfloat16)
    out_bf16 = jax.block_until_ready(out_bf16)
    assert out_bf16.shape == (B, S)
    assert jnp.allclose(out_bf16, ref, atol=3e-2, rtol=3e-2), "bf16 mismatch"
    assert jnp.allclose(jnp.sum(out_bf16, axis=1), 1.0, atol=1e-3)

    print("KERNEL_OK")
</pallas_src>

<mosaic_0001>
module attributes {stable_mosaic.version = 11 : i64} {
  func.func @_attn_kernel(%arg0: i32, %arg1: memref<8x8x32xf32, #tpu.memory_space<vmem>>, %arg2: memref<8x32xf32, #tpu.memory_space<vmem>>, %arg3: memref<32x32xf32, #tpu.memory_space<vmem>>, %arg4: memref<1x32xf32, #tpu.memory_space<vmem>>, %arg5: memref<8x8xf32, #tpu.memory_space<vmem>>) attributes {dimension_semantics = [#tpu.dimension_semantics<parallel>], iteration_bounds = array<i64: 1>, scalar_prefetch = 0 : i64, scratch_operands = 0 : i64, tpu.core_type = #tpu.core_type<tc>, window_params = [{transform_indices = @transform_0, window_bounds = array<i64: 8, 8, 32>}, {transform_indices = @transform_1, window_bounds = array<i64: 8, 32>}, {pipeline_mode = #tpu.pipeline_mode<synchronous>, transform_indices = @transform_2, window_bounds = array<i64: 32, 32>}, {pipeline_mode = #tpu.pipeline_mode<synchronous>, transform_indices = @transform_3, window_bounds = array<i64: 1, 32>}, {transform_indices = @transform_4, window_bounds = array<i64: 8, 8>}]} {
    %c0 = arith.constant 0 : index
    %c0_0 = arith.constant 0 : index
    %c0_1 = arith.constant 0 : index
    %0 = vector.load %arg1[%c0, %c0_0, %c0_1] : memref<8x8x32xf32, #tpu.memory_space<vmem>>, vector<8x8x32xf32>
    %c0_2 = arith.constant 0 : index
    %c0_3 = arith.constant 0 : index
    %1 = vector.load %arg3[%c0_2, %c0_3] : memref<32x32xf32, #tpu.memory_space<vmem>>, vector<32x32xf32>
    %cst = arith.constant dense<0.000000e+00> : vector<8x8x32xf32>
    %2 = tpu.matmul %0, %1, %cst {dimension_numbers = #tpu.dot_dimension_numbers<[2], [0], [0, 1], [1], [0, 0, 0, 1, 1, 1], [], []>} : vector<8x8x32xf32>, vector<32x32xf32>, vector<8x8x32xf32> -> vector<8x8x32xf32>
    %c0_4 = arith.constant 0 : index
    %c0_5 = arith.constant 0 : index
    %3 = vector.load %arg2[%c0_4, %c0_5] : memref<8x32xf32, #tpu.memory_space<vmem>>, vector<8x32xf32>
    %4 = vector.shape_cast %3 : vector<8x32xf32> to vector<8x1x32xf32>
    %5 = vector.broadcast %4 : vector<8x1x32xf32> to vector<8x8x32xf32>
    %6 = arith.addf %2, %5 : vector<8x8x32xf32>
    %7 = math.tanh %6 : vector<8x8x32xf32>
    %c0_6 = arith.constant 0 : index
    %c0_7 = arith.constant 0 : index
    %8 = vector.load %arg4[%c0_6, %c0_7] : memref<1x32xf32, #tpu.memory_space<vmem>>, vector<1x32xf32>
    %9 = vector.shape_cast %8 : vector<1x32xf32> to vector<1x1x32xf32>
    %10 = vector.broadcast %9 : vector<1x1x32xf32> to vector<8x8x32xf32>
    %11 = arith.mulf %7, %10 : vector<8x8x32xf32>
    %cst_8 = arith.constant dense<0.000000e+00> : vector<8x8xf32>
    %12 = vector.multi_reduction <add>, %11, %cst_8 [2] : vector<8x8x32xf32> to vector<8x8xf32>
    %cst_9 = arith.constant dense<0xFF800000> : vector<8xf32>
    %13 = vector.multi_reduction <maximumf>, %12, %cst_9 [1] : vector<8x8xf32> to vector<8xf32>
    %14 = vector.shape_cast %13 : vector<8xf32> to vector<8x1xf32>
    %15 = vector.broadcast %14 : vector<8x1xf32> to vector<8x8xf32>
    %16 = arith.subf %12, %15 : vector<8x8xf32>
    %17 = math.exp %16 : vector<8x8xf32>
    %cst_10 = arith.constant dense<0.000000e+00> : vector<8xf32>
    %18 = vector.multi_reduction <add>, %17, %cst_10 [1] : vector<8x8xf32> to vector<8xf32>
    %19 = vector.shape_cast %18 : vector<8xf32> to vector<8x1xf32>
    %20 = tpu.reciprocal %19 : vector<8x1xf32> -> vector<8x1xf32>
    %21 = vector.broadcast %20 : vector<8x1xf32> to vector<8x8xf32>
    %22 = arith.mulf %17, %21 : vector<8x8xf32>
    %c0_11 = arith.constant 0 : index
    %c0_12 = arith.constant 0 : index
    %23 = vector.load %arg5[%c0_11, %c0_12] : memref<8x8xf32, #tpu.memory_space<vmem>>, vector<8x8xf32>
    tpu.vector_store %arg5[%c0_11, %c0_12], %22 {strides = array<i32>} : memref<8x8xf32, #tpu.memory_space<vmem>>, vector<8x8xf32>,
    return
  }
  func.func @transform_0(%arg0: i32) -> (i32, i32, i32) {
    %c0_i32 = arith.constant 0 : i32
    %c0_i32_0 = arith.constant 0 : i32
    %c0_i32_1 = arith.constant 0 : i32
    return %arg0, %c0_i32, %c0_i32_0 : i32, i32, i32
  }
  func.func @transform_1(%arg0: i32) -> (i32, i32) {
    %c0_i32 = arith.constant 0 : i32
    %c0_i32_0 = arith.constant 0 : i32
    return %arg0, %c0_i32 : i32, i32
  }
  func.func @transform_2(%arg0: i32) -> (i32, i32) {
    %c0_i32 = arith.constant 0 : i32
    %c0_i32_0 = arith.constant 0 : i32
    %c0_i32_1 = arith.constant 0 : i32
    return %c0_i32, %c0_i32_0 : i32, i32
  }
  func.func @transform_3(%arg0: i32) -> (i32, i32) {
    %c0_i32 = arith.constant 0 : i32
    %c0_i32_0 = arith.constant 0 : i32
    %c0_i32_1 = arith.constant 0 : i32
    return %c0_i32, %c0_i32_0 : i32, i32
  }
  func.func @transform_4(%arg0: i32) -> (i32, i32) {
    %c0_i32 = arith.constant 0 : i32
    %c0_i32_0 = arith.constant 0 : i32
    return %arg0, %c0_i32 : i32, i32
  }
}

</mosaic_0001>

<bundles_post_ra>
// kernel: tpu_custom_call.1
= control target key start
LH: loop header
LB: loop body
LE: loop exit
PB: predicated region body
PF: predicated region fallthrough
CT: control target
= control target key end

     0   :  { %9 = vsyncpa [#allocation3], 0  ;;  %s1025_s0 = inlined_call_operand.hbm [shape: f32[8,8,32], index: 0, kind: input, shape index: {}]   ;;  %s1026_s1 = inlined_call_operand.hbm [shape: f32[8,32], index: 1, kind: input, shape index: {}]   ;;  %s1027_s2 = inlined_call_operand.hbm [shape: f32[32,32], index: 2, kind: input, shape index: {}]   ;;  %s1028_s3 = inlined_call_operand.vmem [shape: f32[1,32], index: 3, kind: input, shape index: {}]   ;;  %s1029_s4 = inlined_call_operand.hbm [shape: f32[8,8], index: 4, kind: output, shape index: {}]  }
   0x1   :  { %10 = vsyncpa [#allocation6], 0 }
   0x2   :  { %11 = vsyncpa [#allocation4], 0  ;;  %s857_s15 = smov [#allocation5]   ;;  %s858_s17 = smov [#allocation2]  }
   0x3   :  { %s30_s16 = sshll.u32 %s857_s15, 4  ;;  %s17_s18 = sshll.u32 %s858_s17, 4  ;;  %s31_s16 = int_to_ptr.vmem [resolvable:$true] %s30_s16  ;;  %s18_s18 = int_to_ptr.vmem [resolvable:$true] %s17_s18 }
   0x4   :  { %s779_s19 = scalar_lea.vmem %s31_s16, 128  ;;  %p784_p1 = scmp.lt.s32.totalorder %s31_s16, %s31_s16 }
   0x5   :  { %p780_p0 = scmp.ne.s32.totalorder %s31_s16, %s779_s19  ;;  %p785_p2 = scmp.lt.s32.totalorder %s779_s19, %s779_s19 }
   0x7   :  { %p786_p3 = por %p785_p2, %p784_p1 }
   0x9   :  { %p787_p4 = pnand %p786_p3, %p780_p0 }
   0xb   :  { %790 = shalt.err (!%p787_p4)
}
   0xc   :  { %33 = dma.hbm_to_vmem [thread:$0]  %s1026_s1, 128, %s31_s16, [#allocation6]  }
   0xd   :  { %s799_s22 = scalar_lea.vmem %s18_s18, 1024  ;;  %p804_p6 = scmp.lt.s32.totalorder %s18_s18, %s18_s18 }
   0xe   :  { %p800_p5 = scmp.ne.s32.totalorder %s18_s18, %s799_s22  ;;  %p805_p7 = scmp.lt.s32.totalorder %s799_s22, %s799_s22 }
  0x10   :  { %p806_p8 = por %p805_p7, %p804_p6 }
  0x12   :  { %p807_p9 = pnand %p806_p8, %p800_p5 }
  0x14   :  { %810 = shalt.err (!%p807_p9)
}
  0x15   :  { %s859_s23 = smov 128   ;;  %s860_s24 = smov 8  }
  0x16   :  { %23 = dma.hbm_to_vmem [thread:$0]  %s1025_s0, 1024, %s18_s18, [#allocation3], %s859_s23, %s859_s23, %s860_s24  }
  0x17   :  { %s861_s27 = smov [#allocation7]  }
  0x18   :  { %s39_s28 = sshll.u32 %s861_s27, 4  ;;  %s40_s28 = int_to_ptr.vmem [resolvable:$true] %s39_s28 }
  0x19   :  { %s819_s29 = scalar_lea.vmem %s40_s28, 512  ;;  %p824_p11 = scmp.lt.s32.totalorder %s40_s28, %s40_s28 }
  0x1a   :  { %p820_p10 = scmp.ne.s32.totalorder %s40_s28, %s819_s29  ;;  %p825_p12 = scmp.lt.s32.totalorder %s819_s29, %s819_s29 }
  0x1c   :  { %p826_p13 = por %p825_p12, %p824_p11 }
  0x1e   :  { %p827_p0 = pnand %p826_p13, %p820_p10 }
  0x20   :  { %830 = shalt.err (!%p827_p0)
}
  0x21   :  { %45 = dma.hbm_to_vmem [thread:$0]  %s1027_s2, 512, %s40_s28, [#allocation6], %s859_s23, %s859_s23, %s860_s24  }
  0x22   :  { %851 = dma.done.wait [#allocation3], 1024  }
  0x23   :  { %852 = vsyncadd [#allocation3], 4294966272 }
  0x24   :  { %853 = dma.done.wait [#allocation6], 640  }
  0x25   :  { %854 = vsyncadd [#allocation6], 4294966656  ;;  %vm160_vm0 = vcmask 261120   ;;  %v68_v0 = vld [vmem:[#allocation7 + $0x18] sm:$0xff]  ;;  %v67_v1 = vld [vmem:[#allocation7 + $0x10] sm:$0xff]  ;;  %v75_v14 = vlaneseq  ;;  %vm379_vm1 = vcmask 1041409  }
  0x26   :  { %698 = vmatprep.subr.mxu0 %v68_v0  ;;  %718 = vmatprep.subr.mxu1 %v68_v0  ;;  %v57_v2 = vld [vmem:[#allocation2] sm:$0xff]  ;;  %v66_v3 = vld [vmem:[#allocation7 + $0x8] sm:$0xff]  ;;  %v65_v4 = vld [vmem:[#allocation7] sm:$0xff]  ;;  %v862_v12 = vmov 1966171168   ;;  %vm381_vm2 = vcmask 1042434  }
  0x27   :  { %699 = vmatpush3.msra.mxu0 %v68_v0  ;;  %706 = vmatprep.mubr.msk.f32.mxu0 %vm160_vm0, %v57_v2  ;;  %v58_v5 = vld [vmem:[#allocation2 + $0x8] sm:$0xff]  ;;  %v59_v6 = vld [vmem:[#allocation2 + $0x10] sm:$0xff]  ;;  %v61_v7 = vld [vmem:[#allocation2 + $0x20] sm:$0xff]  ;;  %v73_v13 = vunpack.c.l.s4 %v862_v12  ;;  %v908_v16 = vshrl.u32 %v75_v14, 7  ;;  %vm383_vm3 = vcmask 1043459   ;;  %vm385_vm4 = vcmask 1044484  }
  0x28   :  { %700 = vmatprep.subr.mxu0 %v67_v1  ;;  %722 = vmatpush3.msra.mxu1 %v68_v0  ;;  %v62_v8 = vld [vmem:[#allocation2 + $0x28] sm:$0xff]  ;;  %v63_v9 = vld [vmem:[#allocation2 + $0x30] sm:$0xff]  ;;  %v60_v10 = vld [vmem:[#allocation2 + $0x18] sm:$0xff]  ;;  %vm387_vm5 = vcmask 1045509   ;;  %vm389_vm6 = vcmask 1046534   ;;  %vm391_vm7 = vcmask 1047559  }
  0x29   :  { %701 = vmatpush3.msra.mxu0 %v67_v1  ;;  %719 = vmatprep.subr.mxu1 %v67_v1  ;;  %v64_v11 = vld [vmem:[#allocation2 + $0x38] sm:$0xff]  ;;  %v74_v15 = vunpack.c.0.s8 %v73_v13  ;;  %v69_v18 = vld [vmem:[#allocation5] sm:$0xff]  ;;  %v912_v24 = vsub.s32 0, %v908_v16  ;;  %vm394_vm8 = vcmask 64512  }
  0x2a   :  { %702 = vmatprep.subr.mxu0 %v66_v3  ;;  %723 = vmatpush3.msra.mxu1 %v67_v1  ;;  %v71_v20 = vcombine.high %v69_v18, %v69_v18  ;;  %v685_v57 = vld [vmem:[%s1028_s3] ss:$0 sm:$0xff]  ;;  %s864_s3 = smov [#allocation8]  }
  0x2b   :  { %703 = vmatpush3.msra.mxu0 %v66_v3  ;;  %720 = vmatprep.subr.mxu1 %v66_v3  ;;  %v77_v17 = vsub.s32 %v74_v15, %v908_v16  ;;  %s667_s5 = sshll.u32 %s864_s3, 4  ;;  %s668_s5 = int_to_ptr.vmem [resolvable:$true] %s667_s5 }
  0x2c   :  { %704 = vmatprep.subr.mxu0 %v65_v4  ;;  %724 = vmatpush3.msra.mxu1 %v66_v3  ;;  %s831_s6 = scalar_lea.vmem %s668_s5, 128  ;;  %p836_p2 = scmp.lt.s32.totalorder %s668_s5, %s668_s5 }
  0x2d   :  { %705 = vmatpush3.msra.mxu0 %v65_v4  ;;  %721 = vmatprep.subr.mxu1 %v65_v4  ;;  %v78_v19 = vrot.slane %v69_v18, %v77_v17  ;;  %v85_v22 = vrot.slane %v71_v20, %v77_v17  ;;  %v346_v20 = vand.u32 127, %v75_v14  ;;  %p832_p1 = scmp.ne.s32.totalorder %s668_s5, %s831_s6  ;;  %p837_p3 = scmp.lt.s32.totalorder %s831_s6, %s831_s6 }
  0x2e   :  { %707 = vmatmul.mubr.msk.f32.vlgmr.msra.gmra.mxu0 %vm160_vm0, %v58_v5  ;;  %725 = vmatpush3.msra.mxu1 %v65_v4 }
  0x2f   :  { %709 = vmatprep.mubr.msk.f32.mxu0 %vm160_vm0, %v59_v6  ;;  %712 = vmatprep.mubr.msk.f32.mxu1 %vm160_vm0, %v61_v7  ;;  %v86_v21 = vcombine.high %v78_v19, %v78_v19  ;;  %v87_v25 = vcombine.high %v85_v22, %v85_v22  ;;  %v94_v26 = vrot.slane %v78_v19, %v77_v17  ;;  %p838_p4 = por %p837_p3, %p836_p2 }
  0x30   :  { %713 = vmatmul.mubr.msk.f32.vlgmr.msra.gmra.mxu1 %vm160_vm0, %v62_v8  ;;  %v101_v29 = vrot.slane %v85_v22, %v77_v17  ;;  %v935_v22 = vsub.s32 %v346_v20, %v908_v16 }
  0x31   :  { %715 = vmatprep.mubr.msk.f32.mxu1 %vm160_vm0, %v63_v9  ;;  %v108_v23 = vrot.slane %v86_v21, %v77_v17  ;;  %v115_v30 = vrot.slane %v87_v25, %v77_v17  ;;  %v123_v31 = vrot.slane %v94_v26, %v912_v24  ;;  %v116_v32 = vcombine.high %v94_v26, %v94_v26  ;;  %p839_p5 = pnand %p838_p4, %p832_p1 }
  0x32   :  { %710 = vmatmul.mubr.msk.f32.gmra.mxu0 %vm160_vm0, %v60_v10  ;;  %v139_v36 = vrot.slane %v101_v29, %v912_v24  ;;  %v117_v37 = vcombine.high %v101_v29, %v101_v29 }
  0x33   :  { %v127_v27 = vrot.slane %v108_v23, %v912_v24  ;;  %v118_v28 = vcombine.high %v108_v23, %v108_v23  ;;  %v143_v39 = vrot.slane %v115_v30, %v912_v24  ;;  %v131_v42 = vrot.slane %v116_v32, %v912_v24 }
  0x34   :  { %716 = vmatmul.mubr.msk.f32.gmra.mxu1 %vm160_vm0, %v64_v11  ;;  %v119_v43 = vcombine.high %v115_v30, %v115_v30  ;;  %v147_v48 = vrot.slane %v117_v37, %v912_v24 }
  0x35   :  { %v135_v35 = vrot.slane %v118_v28, %v912_v24 }
  0x36   :  { %v151_v53 = vrot.slane %v119_v43, %v912_v24 }
  0xee   :  { %v708_v33 = vpop.f32.mrf.mxu0 }
  0xef   :  { %v257_v34 = vadd.f32 %v708_v33, %v127_v27 }
  0xf0   :  { %v251_v38 = vpop.f32.mrf.mxu0  ;;  %v714_v40 = vpop.f32.mrf.mxu1 }
  0xf1   :  { %737 = vtanh.f32 %v257_v34  ;;  %v252_v41 = vadd.f32 %v251_v38, %v123_v31  ;;  %v277_v50 = vadd.f32 %v714_v40, %v143_v39 }
  0xf2   :  { %v711_v44 = vpop.f32.mrf.mxu0  ;;  %v271_v45 = vpop.f32.mrf.mxu1 }
  0xf3   :  { %739 = vtanh.f32 %v252_v41  ;;  %v267_v46 = vadd.f32 %v711_v44, %v135_v35  ;;  %v272_v47 = vadd.f32 %v271_v45, %v139_v36 }
  0xf4   :  { %v261_v49 = vpop.f32.mrf.mxu0  ;;  %v717_v51 = vpop.f32.mrf.mxu1 }
  0xf5   :  { %741 = vtanh.f32 %v267_v46  ;;  %v262_v52 = vadd.f32 %v261_v49, %v131_v42  ;;  %v287_v56 = vadd.f32 %v717_v51, %v151_v53  ;;  %v863_v46 = vmov 0  }
  0xf6   :  { %743 = vtanh.f32 %v272_v47  ;;  %v281_v54 = vpop.f32.mrf.mxu1  ;;  %735 = vset.pattern.permute.xlu0 %v863_v46  ;;  %734 = vset.pattern.permute.xlu1 %v863_v46  ;;  %v405_v47 = vsub.s32 1, %v908_v16  ;;  %v413_v49 = vsub.s32 3, %v908_v16 }
  0xf7   :  { %745 = vtanh.f32 %v262_v52  ;;  %v282_v55 = vadd.f32 %v281_v54, %v147_v48  ;;  %v409_v48 = vsub.s32 2, %v908_v16  ;;  %v417_v54 = vsub.s32 4, %v908_v16 }
  0xf8   :  { %747 = vtanh.f32 %v277_v50 }
  0xf9   :  { %749 = vtanh.f32 %v282_v55 }
  0xfa   :  { %751 = vtanh.f32 %v287_v56 }
  0xfe   :  { %v738_v58 = vpop.eup %737 }
  0xff   :  { %v306_v59 = vmul.f32 %v738_v58, %v685_v57 }
 0x100   :  { %v740_v60 = vpop.eup %739 }
 0x101   :  { %v316_v61 = vsel %vm160_vm0, %v306_v59, 0.0  ;;  %v305_v62 = vmul.f32 %v740_v60, %v685_v57 }
 0x102   :  { %v742_v63 = vpop.eup %741  ;;  %317 = vadd.xlane.f32.xlu0 %v316_v61  ;;  %v421_v61 = vsub.s32 5, %v908_v16 }
 0x103   :  { %v744_v0 = vpop.eup %743  ;;  %v308_v1 = vmul.f32 %v742_v63, %v685_v57  ;;  %v313_v6 = vsel %vm160_vm0, %v305_v62, 0.0 }
 0x104   :  { %v746_v2 = vpop.eup %745  ;;  %v309_v3 = vmul.f32 %v744_v0, %v685_v57 }
 0x105   :  { %v748_v4 = vpop.eup %747  ;;  %v322_v5 = vsel %vm160_vm0, %v308_v1, 0.0  ;;  %v307_v7 = vmul.f32 %v746_v2, %v685_v57  ;;  %v425_v1 = vsub.s32 6, %v908_v16 }
 0x106   :  { %v750_v8 = vpop.eup %749  ;;  %323 = vadd.xlane.f32.xlu1 %v322_v5  ;;  %314 = vadd.xlane.f32.xlu0 %v313_v6  ;;  %v325_v9 = vsel %vm160_vm0, %v309_v3, 0.0  ;;  %v310_v12 = vmul.f32 %v748_v4, %v685_v57  ;;  %v429_v5 = vsub.s32 7, %v908_v16 }
 0x107   :  { %v311_v10 = vmul.f32 %v750_v8, %v685_v57  ;;  %v319_v11 = vsel %vm160_vm0, %v307_v7, 0.0  ;;  %v752_v13 = vpop.eup %751 }
 0x108   :  { %v328_v17 = vsel %vm160_vm0, %v310_v12, 0.0  ;;  %v312_v18 = vmul.f32 %v752_v13, %v685_v57 }
 0x109   :  { %v331_v15 = vsel %vm160_vm0, %v311_v10, 0.0 }
 0x10a   :  { %320 = vadd.xlane.f32.xlu1 %v319_v11  ;;  %326 = vadd.xlane.f32.xlu0 %v325_v9  ;;  %v334_v19 = vsel %vm160_vm0, %v312_v18, 0.0 }
 0x10e   :  { %329 = vadd.xlane.f32.xlu1 %v328_v17  ;;  %332 = vadd.xlane.f32.xlu0 %v331_v15 }
 0x112   :  { %335 = vadd.xlane.f32.xlu1 %v334_v19 }
 0x18b   :  { %v318_v21 = vpop.xlane.xlu0 %317 }
 0x18c   :  { %v354_v27 = vrot.slane %v318_v21, %v935_v22 }
 0x18f   :  { %v324_v23 = vpop.xlane.xlu1 %323  ;;  %v315_v25 = vpop.xlane.xlu0 %314 }
 0x190   :  { %v350_v26 = vrot.slane %v315_v25, %v935_v22  ;;  %v362_v14 = vrot.slane %v324_v23, %v935_v22 }
 0x192   :  { %v380_v32 = vsel %vm379_vm1, %v354_v27, %v350_v26 }
 0x193   :  { %v321_v28 = vpop.xlane.xlu1 %320  ;;  %v327_v29 = vpop.xlane.xlu0 %326 }
 0x194   :  { %v358_v30 = vrot.slane %v321_v28, %v935_v22  ;;  %v366_v31 = vrot.slane %v327_v29, %v935_v22 }
 0x196   :  { %v382_v33 = vsel %vm381_vm2, %v358_v30, %v380_v32 }
 0x197   :  { %v384_v34 = vsel %vm383_vm3, %v362_v14, %v382_v33  ;;  %v330_v35 = vpop.xlane.xlu1 %329  ;;  %v333_v36 = vpop.xlane.xlu0 %332 }
 0x198   :  { %v386_v37 = vsel %vm385_vm4, %v366_v31, %v384_v34  ;;  %v370_v38 = vrot.slane %v330_v35, %v935_v22  ;;  %v374_v39 = vrot.slane %v333_v36, %v935_v22 }
 0x19a   :  { %v388_v40 = vsel %vm387_vm5, %v370_v38, %v386_v37 }
 0x19b   :  { %v336_v41 = vpop.xlane.xlu1 %335  ;;  %v390_v43 = vsel %vm389_vm6, %v374_v39, %v388_v40 }
 0x19c   :  { %v378_v42 = vrot.slane %v336_v41, %v935_v22 }
 0x19e   :  { %v392_v44 = vsel %vm391_vm7, %v378_v42, %v390_v43 }
 0x19f   :  { %v395_v45 = vsel %vm394_vm8, %v392_v44, -inf }
 0x1a0   :  { %396 = vmax.xlane.f32.xlu0 %v395_v45 }
 0x229   :  { %v397_v50 = vpop.xlane.xlu0 %396 }
 0x22a   :  { %v402_v51 = vrot.slane %v397_v50, %v912_v24  ;;  %v406_v52 = vrot.slane %v397_v50, %v405_v47  ;;  %v410_v53 = vrot.slane %v397_v50, %v409_v48  ;;  %v414_v55 = vrot.slane %v397_v50, %v413_v49 }
 0x22b   :  { %v418_v62 = vrot.slane %v397_v50, %v417_v54  ;;  %v422_v2 = vrot.slane %v397_v50, %v421_v61  ;;  %v426_v6 = vrot.slane %v397_v50, %v425_v1  ;;  %v430_v9 = vrot.slane %v397_v50, %v429_v5 }
 0x22c   :  { %v439_v56 = vsub.f32 %v315_v25, %v402_v51  ;;  %v440_v57 = vsub.f32 %v318_v21, %v406_v52  ;;  %v441_v58 = vsub.f32 %v321_v28, %v410_v53  ;;  %v442_v63 = vsub.f32 %v324_v23, %v414_v55 }
 0x22d   :  { %v443_v3 = vsub.f32 %v327_v29, %v418_v62  ;;  %v444_v7 = vsub.f32 %v330_v35, %v422_v2  ;;  %v445_v10 = vsub.f32 %v333_v36, %v426_v6  ;;  %v446_v15 = vsub.f32 %v336_v41, %v430_v9 }
 0x22e   :  { %v447_v59 = vmul.f32 1.442695, %v439_v56  ;;  %v449_v60 = vmul.f32 1.442695, %v440_v57  ;;  %v451_v0 = vmul.f32 1.442695, %v441_v58 }
 0x22f   :  { %v453_v4 = vmul.f32 1.442695, %v442_v63  ;;  %v455_v8 = vmul.f32 1.442695, %v443_v3  ;;  %v457_v11 = vmul.f32 1.442695, %v444_v7 }
 0x230   :  { %753 = vpow2.f32 %v447_v59  ;;  %v459_v17 = vmul.f32 1.442695, %v445_v10  ;;  %v461_v19 = vmul.f32 1.442695, %v446_v15 }
 0x231   :  { %755 = vpow2.f32 %v449_v60 }
 0x232   :  { %757 = vpow2.f32 %v451_v0 }
 0x233   :  { %759 = vpow2.f32 %v453_v4 }
 0x234   :  { %761 = vpow2.f32 %v455_v8 }
 0x235   :  { %763 = vpow2.f32 %v457_v11 }
 0x236   :  { %765 = vpow2.f32 %v459_v17 }
 0x237   :  { %767 = vpow2.f32 %v461_v19 }
 0x23d   :  { %v754_v12 = vpop.eup %753 }
 0x23e   :  { %v756_v13 = vpop.eup %755  ;;  %472 = vperm.xlu1 %734, %v754_v12  }
 0x23f   :  { %475 = vperm.xlu0 %735, %v756_v13   ;;  %v758_v18 = vpop.eup %757 }
 0x240   :  { %v760_v20 = vpop.eup %759 }
 0x241   :  { %v762_v21 = vpop.eup %761 }
 0x242   :  { %478 = vperm.xlu1 %734, %v758_v18   ;;  %v764_v23 = vpop.eup %763 }
 0x243   :  { %v766_v25 = vpop.eup %765 }
 0x244   :  { %v768_v26 = vpop.eup %767 }
 0x246   :  { %481 = vperm.xlu1 %734, %v760_v20  }
 0x24a   :  { %484 = vperm.xlu1 %734, %v762_v21  }
 0x24e   :  { %487 = vperm.xlu1 %734, %v764_v23  }
 0x252   :  { %490 = vperm.xlu1 %734, %v766_v25  }
 0x256   :  { %493 = vperm.xlu1 %734, %v768_v26  }
 0x2b9   :  { %v473_v27 = vpop.permute.xlu1 %472 }
 0x2ba   :  { %v476_v31 = vpop.permute.xlu0 %475  ;;  %v498_v33 = vrot.slane %v473_v27, %v935_v22 }
 0x2bb   :  { %v502_v32 = vrot.slane %v476_v31, %v935_v22 }
 0x2bd   :  { %v479_v28 = vpop.permute.xlu1 %478  ;;  %v527_v38 = vsel %vm379_vm1, %v502_v32, %v498_v33 }
 0x2be   :  { %v506_v34 = vrot.slane %v479_v28, %v935_v22 }
 0x2c0   :  { %v528_v40 = vsel %vm381_vm2, %v506_v34, %v527_v38 }
 0x2c1   :  { %v482_v29 = vpop.permute.xlu1 %481 }
 0x2c2   :  { %v510_v35 = vrot.slane %v482_v29, %v935_v22 }
 0x2c4   :  { %v529_v42 = vsel %vm383_vm3, %v510_v35, %v528_v40 }
 0x2c5   :  { %v485_v30 = vpop.permute.xlu1 %484 }
 0x2c6   :  { %v514_v36 = vrot.slane %v485_v30, %v935_v22 }
 0x2c8   :  { %v530_v43 = vsel %vm385_vm4, %v514_v36, %v529_v42 }
 0x2c9   :  { %v488_v14 = vpop.permute.xlu1 %487 }
 0x2ca   :  { %v518_v39 = vrot.slane %v488_v14, %v935_v22 }
 0x2cc   :  { %v531_v45 = vsel %vm387_vm5, %v518_v39, %v530_v43 }
 0x2cd   :  { %v491_v37 = vpop.permute.xlu1 %490 }
 0x2ce   :  { %v522_v41 = vrot.slane %v491_v37, %v935_v22 }
 0x2d0   :  { %v532_v50 = vsel %vm389_vm6, %v522_v41, %v531_v45 }
 0x2d1   :  { %v494_v44 = vpop.permute.xlu1 %493 }
 0x2d2   :  { %v526_v46 = vrot.slane %v494_v44, %v935_v22 }
 0x2d4   :  { %v533_v51 = vsel %vm391_vm7, %v526_v46, %v532_v50 }
 0x2d5   :  { %v535_v52 = vsel %vm394_vm8, %v533_v51, 0.0 }
 0x2d6   :  { %536 = vadd.xlane.f32.xlu1 %v535_v52 }
 0x35f   :  { %v537_v53 = vpop.xlane.xlu1 %536 }
 0x360   :  { %769 = vrcp.f32 %v537_v53 }
 0x36d   :  { %v770_v55 = vpop.eup %769 }
 0x36e   :  { %v543_v56 = vrot.slane %v770_v55, %v912_v24  ;;  %v547_v58 = vrot.slane %v770_v55, %v405_v47  ;;  %v551_v60 = vrot.slane %v770_v55, %v409_v48  ;;  %v555_v63 = vrot.slane %v770_v55, %v413_v49 }
 0x36f   :  { %v559_v2 = vrot.slane %v770_v55, %v417_v54  ;;  %v563_v47 = vrot.slane %v770_v55, %v421_v61  ;;  %v567_v48 = vrot.slane %v770_v55, %v425_v1  ;;  %v571_v49 = vrot.slane %v770_v55, %v429_v5 }
 0x370   :  { %v580_v57 = vmul.f32 %v754_v12, %v543_v56  ;;  %v581_v59 = vmul.f32 %v756_v13, %v547_v58  ;;  %v582_v62 = vmul.f32 %v758_v18, %v551_v60  ;;  %v583_v0 = vmul.f32 %v760_v20, %v555_v63 }
 0x371   :  { %v584_v24 = vmul.f32 %v762_v21, %v559_v2  ;;  %v585_v3 = vmul.f32 %v764_v23, %v563_v47  ;;  %v586_v4 = vmul.f32 %v766_v25, %v567_v48  ;;  %v587_v6 = vmul.f32 %v768_v26, %v571_v49 }
 0x372   :  { %597 = vperm.xlu0 %735, %v580_v57  }
 0x376   :  { %600 = vperm.xlu0 %735, %v581_v59  }
 0x37a   :  { %603 = vperm.xlu0 %735, %v582_v62  }
 0x37e   :  { %606 = vperm.xlu0 %735, %v583_v0  }
 0x382   :  { %609 = vperm.xlu0 %735, %v584_v24  }
 0x386   :  { %612 = vperm.xlu0 %735, %v585_v3  }
 0x38a   :  { %615 = vperm.xlu0 %735, %v586_v4  }
 0x38e   :  { %618 = vperm.xlu0 %735, %v587_v6  }
 0x3ed   :  { %v598_v7 = vpop.permute.xlu0 %597 }
 0x3ee   :  { %v623_v1 = vrot.slane %v598_v7, %v935_v22 }
 0x3f1   :  { %v601_v54 = vpop.permute.xlu0 %600 }
 0x3f2   :  { %v627_v61 = vrot.slane %v601_v54, %v935_v22 }
 0x3f4   :  { %v652_v15 = vsel %vm379_vm1, %v627_v61, %v623_v1 }
 0x3f5   :  { %v604_v8 = vpop.permute.xlu0 %603 }
 0x3f6   :  { %v631_v12 = vrot.slane %v604_v8, %v935_v22 }
 0x3f8   :  { %v653_v18 = vsel %vm381_vm2, %v631_v12, %v652_v15 }
 0x3f9   :  { %v607_v9 = vpop.permute.xlu0 %606 }
 0x3fa   :  { %v635_v13 = vrot.slane %v607_v9, %v935_v22 }
 0x3fc   :  { %v654_v20 = vsel %vm383_vm3, %v635_v13, %v653_v18 }
 0x3fd   :  { %v610_v10 = vpop.permute.xlu0 %609 }
 0x3fe   :  { %v639_v16 = vrot.slane %v610_v10, %v935_v22 }
 0x400   :  { %v655_v21 = vsel %vm385_vm4, %v639_v16, %v654_v20 }
 0x401   :  { %v613_v11 = vpop.permute.xlu0 %612 }
 0x402   :  { %v643_v17 = vrot.slane %v613_v11, %v935_v22 }
 0x404   :  { %v656_v25 = vsel %vm387_vm5, %v643_v17, %v655_v21 }
 0x405   :  { %v616_v5 = vpop.permute.xlu0 %615 }
 0x406   :  { %v647_v19 = vrot.slane %v616_v5, %v935_v22 }
 0x408   :  { %v657_v27 = vsel %vm389_vm6, %v647_v19, %v656_v25 }
 0x409   :  { %v619_v23 = vpop.permute.xlu0 %618 }
 0x40a   :  { %v651_v26 = vrot.slane %v619_v23, %v935_v22 }
 0x40c   :  { %v658_v28 = vsel %vm391_vm7, %v651_v26, %v657_v27 }
 0x40d   :  { %660 = vst.msk [vmem:[#allocation8] sm:$0xff] %vm394_vm8, %v658_v28 }
 0x40e   :  { %842 = shalt.err (!%p839_p5)
}
 0x40f   :  { %670 = dma.vmem_to_hbm [thread:$0]  %s668_s5, 128, %s1029_s4, [#allocation4]  }
 0x410   :  { %855 = dma.done.wait [#allocation4], 128  }
 0x411   :  { %856 = vsyncadd [#allocation4], 4294967168 }
 0x412   :  { %674 = vsyncpa [#allocation3], 1 }
 0x413   :  { %675 = vsyncpa [#allocation6], 1 }
 0x414   :  { %676 = vsyncpa [#allocation4], 1 }

</bundles_post_ra>
